<compile_context>
chip_gen: v5e
topology: v5e:2x2
jax: 0.10.0
libtpu: 0.0.40
codegen_flags: <defaults>
</compile_context>

<pallas_src>
import functools

import jax
import jax.numpy as jnp
from jax.experimental import pallas as pl
from jax.experimental.pallas import tpu as pltpu

_VMEM_LIMIT_BYTES = 32 * 1024 * 1024  # explicit, safe on v5e / v6e / v7x


def _round_up(x, m):
    return ((x + m - 1) // m) * m


def _choose_tile_rows(n, c, elementwise_out, tile_rows=None):
    """Rows per tile: ~4 MiB f32 per (TN, C) buffer (2 MiB when an (TN, C)
    output tile is also live), TN a multiple of 8, capped at the problem size."""
    if tile_rows is not None:
        return max(8, _round_up(int(tile_rows), 8))
    budget = (2 if elementwise_out else 4) * 1024 * 1024
    tn = (budget // (4 * max(c, 1))) // 8 * 8
    tn = max(tn, 8)
    return min(tn, _round_up(n, 8))


# ---------------------------------------------------------------------------
# Kernel bodies
# ---------------------------------------------------------------------------

def _target_block(tgt_ref, n, c, dtype, onehot):
    if onehot:
        return tgt_ref[...].astype(dtype)
    # Index targets: class index == C (background) falls outside [0, C-1]
    # -> all-zero row, matching F.one_hot(..., C+1)[:, :C].
    col = jax.lax.broadcasted_iota(jnp.int32, (n, c), 1)
    return (col == tgt_ref[...]).astype(dtype)


def _focal_terms(x, t, gamma, alpha):
    """Per-element weighted focal BCE. x, t: (TN, C) float32."""
    # One exp per element, shared by sigmoid and the stable BCE log term.
    e = jnp.exp(-jnp.abs(x))                       # EUP
    inv = 1.0 / (1.0 + e)                          # sigmoid(|x|)
    ps = jnp.where(x >= 0.0, inv, e * inv)         # sigmoid(x), exact
    # pt = (1-ps)*t + ps*(1-t)  ==  ps + t*(1 - 2*ps)
    pt = ps + t * (1.0 - 2.0 * ps)
    # alpha*t + (1-alpha)*(1-t) == (1-alpha) + (2*alpha-1)*t
    alpha_w = (1.0 - alpha) + (2.0 * alpha - 1.0) * t
    if gamma == 2.0:                               # default: VPU only, no pow
        mod = pt * pt
    elif gamma == 1.0:
        mod = pt
    elif gamma == 0.0:
        mod = jnp.ones_like(pt)
    else:                                          # general gamma: exp/log
        mod = pt ** gamma
    # Numerically stable BCE-with-logits: max(x,0) - x*t + log1p(exp(-|x|))
    bce = jnp.maximum(x, 0.0) - x * t + jnp.log1p(e)
    return bce * alpha_w * mod


def _focal_sum_kernel(pred_ref, tgt_ref, w_ref, psum_ref, *, gamma, alpha, onehot):
    # Resident (1,1) accumulator output across the (arbitrary) grid axis.
    @pl.when(pl.program_id(0) == 0)
    def _():
        psum_ref[...] = jnp.zeros_like(psum_ref)

    x = pred_ref[...].astype(jnp.float32)
    n, c = x.shape
    t = _target_block(tgt_ref, n, c, jnp.float32, onehot)
    loss = _focal_terms(x, t, gamma, alpha) * w_ref[...].astype(jnp.float32)
    psum_ref[...] = psum_ref[...] + jnp.sum(loss)


def _focal_elem_kernel(pred_ref, tgt_ref, w_ref, loss_ref, *, gamma, alpha, onehot):
    x = pred_ref[...].astype(jnp.float32)
    n, c = x.shape
    t = _target_block(tgt_ref, n, c, jnp.float32, onehot)
    loss = _focal_terms(x, t, gamma, alpha) * w_ref[...].astype(jnp.float32)
    loss_ref[...] = loss.astype(loss_ref.dtype)


# ---------------------------------------------------------------------------
# Wrapper
# ---------------------------------------------------------------------------

def _build_call(n_pad, c, tn, tgt_cols, w_cols, onehot, gamma, alpha,
                elementwise, out_dtype):
    grid = (n_pad // tn,)
    in_specs = [
        pl.BlockSpec((tn, c), lambda i: (i, 0)),
        pl.BlockSpec((tn, tgt_cols), lambda i: (i, 0)),
        pl.BlockSpec((tn, w_cols), lambda i: (i, 0)),
    ]
    if elementwise:
        kernel = functools.partial(_focal_elem_kernel, gamma=gamma, alpha=alpha,
                                   onehot=onehot)
        out_specs = pl.BlockSpec((tn, c), lambda i: (i, 0))
        out_shape = jax.ShapeDtypeStruct((n_pad, c), out_dtype)
        dims = ("parallel",)
    else:
        kernel = functools.partial(_focal_sum_kernel, gamma=gamma, alpha=alpha,
                                   onehot=onehot)
        out_specs = pl.BlockSpec((1, 1), lambda i: (0, 0))
        out_shape = jax.ShapeDtypeStruct((1, 1), jnp.float32)
        dims = ("arbitrary",)  # carried accumulator -> reduction axis
    return pl.pallas_call(
        kernel,
        grid=grid,
        in_specs=in_specs,
        out_specs=out_specs,
        out_shape=out_shape,
        compiler_params=pltpu.CompilerParams(
            dimension_semantics=dims,
            vmem_limit_bytes=_VMEM_LIMIT_BYTES,
        ),
    )


def focal_loss_forward(pred, target, weight=None, *, gamma=2.0, alpha=0.25,
                       reduction='mean', avg_factor=None, loss_weight=1.0,
                       tile_rows=None):
    """JAX/Pallas equivalent of FocalLoss(use_sigmoid=True, activated=False).forward."""
    assert reduction in ('none', 'mean', 'sum')
    n, c = pred.shape
    pred = pred.astype(jnp.float32)  # keep f32 intermediates (v5e VPU/EUP)

    onehot = (target.ndim == pred.ndim)
    if onehot:
        tgt = target.astype(jnp.float32)
    else:
        tgt = target.reshape(n, 1).astype(jnp.int32)
    tgt_cols = tgt.shape[1]

    if weight is None:
        w = jnp.ones((n, 1), jnp.float32)
    elif weight.ndim == 2 and weight.shape == (n, c):
        w = weight.astype(jnp.float32)
    else:
        w = weight.reshape(n, 1).astype(jnp.float32)
    w_cols = w.shape[1]

    elementwise = (reduction == 'none')
    tn = _choose_tile_rows(n, c, elementwise, tile_rows)
    n_pad = _round_up(n, tn)
    pad = n_pad - n
    if pad:
        pred = jnp.pad(pred, ((0, pad), (0, 0)))
        tgt = jnp.pad(tgt, ((0, pad), (0, 0)))   # padded class 0 / zeros
        w = jnp.pad(w, ((0, pad), (0, 0)))       # zero weight -> no contribution

    call = _build_call(n_pad, c, tn, tgt_cols, w_cols, onehot,
                       float(gamma), float(alpha), elementwise, pred.dtype)
    out = call(pred, tgt, w)

    if elementwise:
        return loss_weight * out[:n]
    total = out[0, 0]
    if reduction == 'sum':
        return loss_weight * total
    # 'mean': divide by numel (matches mmdet weight_reduce_loss) or avg_factor.
    if avg_factor is None:
        denom = jnp.asarray(n * c, jnp.float32)
    else:
        denom = jnp.asarray(avg_factor, jnp.float32)
    return loss_weight * (total / denom)


class FocalLoss:
    """Thin module-like wrapper mirroring mmdet FocalLoss (sigmoid, logits)."""

    def __init__(self, use_sigmoid=True, gamma=2.0, alpha=0.25,
                 reduction='mean', loss_weight=1.0, activated=False):
        assert use_sigmoid is True, 'Only sigmoid focal loss supported now.'
        assert activated is False, 'Only logit inputs (activated=False) supported.'
        self.gamma = gamma
        self.alpha = alpha
        self.reduction = reduction
        self.loss_weight = loss_weight

    def __call__(self, pred, target, weight=None, avg_factor=None,
                 reduction_override=None):
        assert reduction_override in (None, 'none', 'mean', 'sum')
        reduction = reduction_override if reduction_override else self.reduction
        return focal_loss_forward(pred, target, weight,
                                  gamma=self.gamma, alpha=self.alpha,
                                  reduction=reduction, avg_factor=avg_factor,
                                  loss_weight=self.loss_weight)


# ---------------------------------------------------------------------------
# Pure-JAX reference (py_sigmoid_focal_loss + weight_reduce_loss semantics)
# ---------------------------------------------------------------------------

def _reference(pred, target, weight=None, gamma=2.0, alpha=0.25,
               reduction='mean', avg_factor=None):
    n, c = pred.shape
    if target.ndim != pred.ndim:
        t = jax.nn.one_hot(target, c + 1, dtype=pred.dtype)[:, :c]
    else:
        t = target.astype(pred.dtype)
    ps = jax.nn.sigmoid(pred)
    pt = (1 - ps) * t + ps * (1 - t)
    fw = (alpha * t + (1 - alpha) * (1 - t)) * pt ** gamma
    bce = jnp.maximum(pred, 0) - pred * t + jnp.log1p(jnp.exp(-jnp.abs(pred)))
    loss = bce * fw
    if weight is not None:
        loss = loss * weight.reshape(n, -1)
    if reduction == 'none':
        return loss
    if reduction == 'sum':
        return jnp.sum(loss)
    if avg_factor is None:
        return jnp.mean(loss)
    return jnp.sum(loss) / avg_factor


if __name__ == "__main__":
    key = jax.random.PRNGKey(0)
    k1, k2, k3 = jax.random.split(key, 3)
    N, C = 37, 16  # N deliberately not a multiple of 8 to exercise padding
    pred = jax.random.normal(k1, (N, C), dtype=jnp.float32)            # logits
    target = jax.random.randint(k2, (N,), 0, C + 1, dtype=jnp.int32)   # C = bg
    weight = jax.random.uniform(k3, (N,), dtype=jnp.float32)

    # 1) mean, no weight (single tile path)
    out = focal_loss_forward(pred, target, reduction='mean')
    jax.block_until_ready(out)
    ref = _reference(pred, target, reduction='mean')
    assert jnp.allclose(out, ref, rtol=1e-5, atol=1e-6), (out, ref)

    # 2) sum with per-sample weight, multi-tile grid (tile_rows=8 -> 5 tiles)
    out = focal_loss_forward(pred, target, weight, reduction='sum', tile_rows=8)
    jax.block_until_ready(out)
    ref = _reference(pred, target, weight, reduction='sum')
    assert jnp.allclose(out, ref, rtol=1e-5, atol=1e-5), (out, ref)

    # 3) mean with avg_factor
    out = focal_loss_forward(pred, target, weight, reduction='mean',
                             avg_factor=13.0, tile_rows=8)
    jax.block_until_ready(out)
    ref = _reference(pred, target, weight, reduction='mean', avg_factor=13.0)
    assert jnp.allclose(out, ref, rtol=1e-5, atol=1e-6), (out, ref)

    # 4) reduction='none', one-hot (N, C) target, multi-tile elementwise path
    target_oh = jax.nn.one_hot(target, C + 1, dtype=jnp.float32)[:, :C]
    out = focal_loss_forward(pred, target_oh, reduction='none', tile_rows=8)
    jax.block_until_ready(out)
    ref = _reference(pred, target_oh, reduction='none')
    assert out.shape == (N, C)
    assert jnp.allclose(out, ref, rtol=1e-5, atol=1e-6)

    # 5) module-style wrapper
    loss_mod = FocalLoss(gamma=2.0, alpha=0.25, reduction='mean', loss_weight=0.5)
    out = loss_mod(pred, target)
    jax.block_until_ready(out)
    ref = 0.5 * _reference(pred, target, reduction='mean')
    assert jnp.allclose(out, ref, rtol=1e-5, atol=1e-6), (out, ref)

    print("KERNEL_OK")
</pallas_src>

<mosaic_0001>
module attributes {stable_mosaic.version = 11 : i64} {
  func.func @_focal_sum_kernel(%arg0: i32, %arg1: memref<40x16xf32, #tpu.memory_space<vmem>>, %arg2: memref<40x1xi32, #tpu.memory_space<vmem>>, %arg3: memref<40x1xf32, #tpu.memory_space<vmem>>, %arg4: memref<1x1xf32, #tpu.memory_space<vmem>>) attributes {dimension_semantics = [#tpu.dimension_semantics<arbitrary>], iteration_bounds = array<i64: 1>, scalar_prefetch = 0 : i64, scratch_operands = 0 : i64, tpu.core_type = #tpu.core_type<tc>, window_params = [{transform_indices = @transform_0, window_bounds = array<i64: 40, 16>}, {transform_indices = @transform_1, window_bounds = array<i64: 40, 1>}, {transform_indices = @transform_2, window_bounds = array<i64: 40, 1>}, {pipeline_mode = #tpu.pipeline_mode<synchronous>, transform_indices = @transform_3, window_bounds = array<i64: 1, 1>}]} {
    %c0_i32 = arith.constant 0 : i32
    %0 = arith.cmpi eq, %arg0, %c0_i32 : i32
    %1 = arith.extui %0 : i1 to i32
    %c0_i32_0 = arith.constant 0 : i32
    %2 = arith.cmpi ne, %1, %c0_i32_0 : i32
    scf.if %2 {
      %cst_19 = arith.constant 0.000000e+00 : f32
      %52 = vector.broadcast %cst_19 : f32 to vector<1x1xf32>
      %c0_20 = arith.constant 0 : index
      %c0_21 = arith.constant 0 : index
      %53 = vector.load %arg4[%c0_20, %c0_21] : memref<1x1xf32, #tpu.memory_space<vmem>>, vector<1x1xf32>
      tpu.vector_store %arg4[%c0_20, %c0_21], %52 {strides = array<i32>} : memref<1x1xf32, #tpu.memory_space<vmem>>, vector<1x1xf32>,
    } else {
    }
    %c0 = arith.constant 0 : index
    %c0_1 = arith.constant 0 : index
    %3 = vector.load %arg1[%c0, %c0_1] : memref<40x16xf32, #tpu.memory_space<vmem>>, vector<40x16xf32>
    %4 = tpu.iota {dimensions = array<i32: 1>} : vector<40x16xi32>
    %c0_2 = arith.constant 0 : index
    %c0_3 = arith.constant 0 : index
    %5 = vector.load %arg2[%c0_2, %c0_3] : memref<40x1xi32, #tpu.memory_space<vmem>>, vector<40x1xi32>
    %6 = vector.broadcast %5 : vector<40x1xi32> to vector<40x16xi32>
    %7 = arith.cmpi eq, %4, %6 : vector<40x16xi32>
    %8 = arith.extui %7 : vector<40x16xi1> to vector<40x16xi32>
    %9 = arith.sitofp %8 : vector<40x16xi32> to vector<40x16xf32>
    %10 = math.absf %3 : vector<40x16xf32>
    %cst = arith.constant 0.000000e+00 : f32
    %11 = vector.broadcast %cst : f32 to vector<40x16xf32>
    %12 = arith.subf %11, %10 : vector<40x16xf32>
    %13 = math.exp %12 : vector<40x16xf32>
    %cst_4 = arith.constant 1.000000e+00 : f32
    %14 = vector.broadcast %cst_4 : f32 to vector<40x16xf32>
    %15 = arith.addf %14, %13 : vector<40x16xf32>
    %cst_5 = arith.constant 1.000000e+00 : f32
    %16 = vector.broadcast %cst_5 : f32 to vector<40x16xf32>
    %17 = arith.divf %16, %15 : vector<40x16xf32>
    %cst_6 = arith.constant 0.000000e+00 : f32
    %18 = vector.broadcast %cst_6 : f32 to vector<40x16xf32>
    %19 = arith.cmpf oge, %3, %18 : vector<40x16xf32>
    %20 = arith.mulf %13, %17 : vector<40x16xf32>
    %21 = arith.select %19, %17, %20 : vector<40x16xi1>, vector<40x16xf32>
    %cst_7 = arith.constant 2.000000e+00 : f32
    %22 = vector.broadcast %cst_7 : f32 to vector<40x16xf32>
    %23 = arith.mulf %22, %21 : vector<40x16xf32>
    %cst_8 = arith.constant 1.000000e+00 : f32
    %24 = vector.broadcast %cst_8 : f32 to vector<40x16xf32>
    %25 = arith.subf %24, %23 : vector<40x16xf32>
    %26 = arith.mulf %9, %25 : vector<40x16xf32>
    %27 = arith.addf %21, %26 : vector<40x16xf32>
    %cst_9 = arith.constant -5.000000e-01 : f32
    %28 = vector.broadcast %cst_9 : f32 to vector<40x16xf32>
    %29 = arith.mulf %28, %9 : vector<40x16xf32>
    %cst_10 = arith.constant 7.500000e-01 : f32
    %30 = vector.broadcast %cst_10 : f32 to vector<40x16xf32>
    %31 = arith.addf %30, %29 : vector<40x16xf32>
    %32 = arith.mulf %27, %27 : vector<40x16xf32>
    %cst_11 = arith.constant 0.000000e+00 : f32
    %33 = vector.broadcast %cst_11 : f32 to vector<40x16xf32>
    %34 = arith.maximumf %3, %33 : vector<40x16xf32>
    %35 = arith.mulf %3, %9 : vector<40x16xf32>
    %36 = arith.subf %34, %35 : vector<40x16xf32>
    %37 = math.log1p %13 : vector<40x16xf32>
    %38 = arith.addf %36, %37 : vector<40x16xf32>
    %39 = arith.mulf %38, %31 : vector<40x16xf32>
    %40 = arith.mulf %39, %32 : vector<40x16xf32>
    %c0_12 = arith.constant 0 : index
    %c0_13 = arith.constant 0 : index
    %41 = vector.load %arg3[%c0_12, %c0_13] : memref<40x1xf32, #tpu.memory_space<vmem>>, vector<40x1xf32>
    %42 = vector.broadcast %41 : vector<40x1xf32> to vector<40x16xf32>
    %43 = arith.mulf %40, %42 : vector<40x16xf32>
    %c0_14 = arith.constant 0 : index
    %c0_15 = arith.constant 0 : index
    %44 = vector.load %arg4[%c0_14, %c0_15] : memref<1x1xf32, #tpu.memory_space<vmem>>, vector<1x1xf32>
    %45 = vector.shape_cast %43 : vector<40x16xf32> to vector<1x40x16xf32>
    %cst_16 = arith.constant dense<0.000000e+00> : vector<1xf32>
    %46 = vector.multi_reduction <add>, %45, %cst_16 [1, 2] : vector<1x40x16xf32> to vector<1xf32>
    %47 = vector.shape_cast %46 : vector<1xf32> to vector<1x1x1xf32>
    %48 = vector.extract %47[0, 0, 0] : f32 from vector<1x1x1xf32>
    %49 = vector.broadcast %48 : f32 to vector<1x1xf32>
    %50 = arith.addf %44, %49 : vector<1x1xf32>
    %c0_17 = arith.constant 0 : index
    %c0_18 = arith.constant 0 : index
    %51 = vector.load %arg4[%c0_17, %c0_18] : memref<1x1xf32, #tpu.memory_space<vmem>>, vector<1x1xf32>
    tpu.vector_store %arg4[%c0_17, %c0_18], %50 {strides = array<i32>} : memref<1x1xf32, #tpu.memory_space<vmem>>, vector<1x1xf32>,
    return
  }
  func.func @transform_0(%arg0: i32) -> (i32, i32) {
    %c0_i32 = arith.constant 0 : i32
    %c0_i32_0 = arith.constant 0 : i32
    return %arg0, %c0_i32 : i32, i32
  }
  func.func @transform_1(%arg0: i32) -> (i32, i32) {
    %c0_i32 = arith.constant 0 : i32
    %c0_i32_0 = arith.constant 0 : i32
    return %arg0, %c0_i32 : i32, i32
  }
  func.func @transform_2(%arg0: i32) -> (i32, i32) {
    %c0_i32 = arith.constant 0 : i32
    %c0_i32_0 = arith.constant 0 : i32
    return %arg0, %c0_i32 : i32, i32
  }
  func.func @transform_3(%arg0: i32) -> (i32, i32) {
    %c0_i32 = arith.constant 0 : i32
    %c0_i32_0 = arith.constant 0 : i32
    %c0_i32_1 = arith.constant 0 : i32
    return %c0_i32, %c0_i32_0 : i32, i32
  }
}

</mosaic_0001>

<bundles_post_ra>
// kernel: tpu_custom_call.1
= control target key start
LH: loop header
LB: loop body
LE: loop exit
PB: predicated region body
PF: predicated region fallthrough
CT: control target
= control target key end

     0   :  { %v432_v2 = vmov 0   ;;  %s742_s0 = inlined_call_operand.vmem [shape: f32[40,16], index: 0, kind: input, shape index: {}]   ;;  %s743_s1 = inlined_call_operand.vmem [shape: s32[40,1], index: 1, kind: input, shape index: {}]   ;;  %s744_s2 = inlined_call_operand.vmem [shape: f32[40,1], index: 2, kind: input, shape index: {}]   ;;  %s745_s3 = inlined_call_operand.hbm [shape: f32[1,1], index: 3, kind: output, shape index: {}]  }
   0x1   :  { %v30_v0 = vld [vmem:[%s743_s1 + $0x10] sm:$0xff]  ;;  %v28_v1 = vld [vmem:[%s743_s1] sm:$0xff]  ;;  %374 = vset.pattern.permute.xlu1 %v432_v2  ;;  %373 = vset.pattern.permute.xlu0 %v432_v2 }
   0x2   :  { %v32_v3 = vld [vmem:[%s743_s1 + $0x20] sm:$0xff]  ;;  %40 = vperm.xlu1 %374, %v30_v0   ;;  %34 = vperm.xlu0 %373, %v28_v1  }
   0x3   :  { %375 = vset.pattern.permute.xlu2 %v432_v2 }
   0x4   :  { %8 = vsyncpa [#allocation3], 0  ;;  %46 = vperm.xlu2 %375, %v32_v3   ;;  %v31_v4 = vld [vmem:[%s743_s1 + $0x18] sm:$0xff]  ;;  %v29_v5 = vld [vmem:[%s743_s1 + $0x8] sm:$0xff]  ;;  %v433_v0 = vmov 0.0   ;;  %s354_s16 = sshll.u32 %s745_s3, 4  ;;  %s355_s16 = int_to_ptr.hbm [resolvable:$true] %s354_s16 }
   0x5   :  { %v288_v6 = vld [vmem:[%s744_s2] sm:$0xff]  ;;  %v290_v7 = vld [vmem:[%s744_s2 + $0x10] sm:$0xff]  ;;  %v289_v8 = vld [vmem:[%s744_s2 + $0x8] sm:$0xff] }
   0x6   :  { %v291_v9 = vld [vmem:[%s744_s2 + $0x18] sm:$0xff]  ;;  %v292_v10 = vld [vmem:[%s744_s2 + $0x20] sm:$0xff]  ;;  %v494_v14 = vld [vmem:[%s742_s0 + $0x10] sm:$0xff] }
   0x7   :  { %v488_v11 = vld [vmem:[%s742_s0] sm:$0xff]  ;;  %v65_v15 = vand.u32 2147483647, %v494_v14  ;;  %v506_v21 = vld [vmem:[%s742_s0 + $0x18] sm:$0xff]  ;;  %v511_v22 = vld [vmem:[%s742_s0 + $0x8] sm:$0xff] }
   0x8   :  { %v63_v12 = vand.u32 2147483647, %v488_v11  ;;  %v500_v18 = vld [vmem:[%s742_s0 + $0x20] sm:$0xff]  ;;  %v66_v23 = vand.u32 2147483647, %v506_v21  ;;  %vm163_vm15 = vcmp.ge.f32.partialorder %v488_v11, 0.0 }
   0x9   :  { %v70_v17 = vsub.f32 0.0, %v65_v15  ;;  %v67_v19 = vand.u32 2147483647, %v500_v18  ;;  %v64_v24 = vand.u32 2147483647, %v511_v22  ;;  %s434_s0 = smov [#allocation2]  }
   0xa   :  { %43 = vperm.xlu1 %374, %v31_v4   ;;  %37 = vperm.xlu0 %373, %v29_v5   ;;  %v68_v13 = vsub.f32 0.0, %v63_v12  ;;  %v71_v26 = vsub.f32 0.0, %v66_v23  ;;  %s352_s13 = sshll.u32 %s434_s0, 4  ;;  %s353_s13 = int_to_ptr.vmem [resolvable:$true] %s352_s13 }
   0xb   :  { %v77_v20 = vmul.f32 1.442695, %v70_v17  ;;  %v72_v25 = vsub.f32 0.0, %v67_v19  ;;  %v69_v29 = vsub.f32 0.0, %v64_v24 }
   0xc   :  { %295 = vperm.xlu2 %375, %v288_v6   ;;  %v73_v16 = vmul.f32 1.442695, %v68_v13  ;;  %v79_v31 = vmul.f32 1.442695, %v71_v26 }
   0xd   :  { %v81_v28 = vmul.f32 1.442695, %v72_v25  ;;  %v75_v33 = vmul.f32 1.442695, %v69_v29  ;;  %v26_v25 = vlaneseq }
   0xe   :  { %376 = vpow2.f32 %v73_v16 }
   0xf   :  { %378 = vpow2.f32 %v77_v20 }
  0x10   :  { %380 = vpow2.f32 %v81_v28 }
  0x12   :  { %305 = vperm.xlu1 %374, %v290_v7   ;;  %300 = vperm.xlu0 %373, %v289_v8  }
  0x14   :  { %310 = vperm.xlu2 %375, %v291_v9   ;;  %v515_v27 = vpop.eup %376 }
  0x15   :  { %v518_v30 = vadd.f32 1.0, %v515_v27  ;;  %v521_v32 = vpop.eup %378 }
  0x16   :  { %v524_v34 = vadd.f32 1.0, %v521_v32  ;;  %v526_v35 = vpop.eup %380 }
  0x17   :  { %382 = vrcp.f32 %v518_v30  ;;  %v529_v37 = vadd.f32 1.0, %v526_v35  ;;  %vm93_vm0 = vweird.f32 %v518_v30  ;;  %v99_v55 = vand.u32 2147483648, %v518_v30 }
  0x18   :  { %384 = vpow2.f32 %v79_v31  ;;  %v97_v58 = vand.u32 2147483647, %v518_v30  ;;  %vm123_vm5 = vweird.f32 %v524_v34  ;;  %v129_v1 = vand.u32 2147483648, %v524_v34 }
  0x19   :  { %386 = vpow2.f32 %v75_v33  ;;  %vm153_vm2 = vweird.f32 %v529_v37  ;;  %v159_v60 = vand.u32 2147483648, %v529_v37  ;;  %v157_v63 = vand.u32 2147483647, %v529_v37 }
  0x1a   :  { %315 = vperm.xlu0 %373, %v292_v10   ;;  %388 = vrcp.f32 %v524_v34  ;;  %v100_v3 = vor.u32 1.1754944e-38, %v99_v55  ;;  %v127_v5 = vand.u32 2147483647, %v524_v34  ;;  %vm98_vm8 = vcmp.eq.f32.partialorder %v97_v58, 8.507059e+37 }
  0x1b   :  { %390 = vrcp.f32 %v529_v37  ;;  %v160_v7 = vor.u32 1.1754944e-38, %v159_v60  ;;  %vm158_vm10 = vcmp.eq.f32.partialorder %v157_v63, 8.507059e+37  ;;  %v130_v12 = vor.u32 1.1754944e-38, %v129_v1 }
  0x1c   :  { %vm128_vm13 = vcmp.eq.f32.partialorder %v127_v5, 8.507059e+37  ;;  %v234_v55 = vand.u32 2147483647, %v515_v27  ;;  %v217_v63 = vmax.f32 %v500_v18, 0.0 }
  0x1d   :  { %v383_v36 = vpop.eup %382 }
  0x1e   :  { %v532_v38 = vpop.eup %384  ;;  %v89_v40 = vmul.f32 %v383_v36, %v518_v30  ;;  %vm94_vm1 = vweird.f32 %v383_v36 }
  0x1f   :  { %v536_v39 = vadd.f32 1.0, %v532_v38  ;;  %v539_v41 = vpop.eup %386  ;;  %vm555_vm4 = vmor %vm93_vm0, %vm94_vm1  ;;  %vm167_vm0 = vcmp.ge.f32.partialorder %v500_v18, 0.0 }
  0x20   :  { %v389_v42 = vpop.eup %388  ;;  %v90_v44 = vsub.f32 1.0, %v89_v40  ;;  %v543_v45 = vadd.f32 1.0, %v539_v41 }
  0x21   :  { %392 = vrcp.f32 %v536_v39  ;;  %v391_v43 = vpop.eup %390  ;;  %v119_v47 = vmul.f32 %v389_v42, %v524_v34  ;;  %vm124_vm6 = vweird.f32 %v389_v42  ;;  %vm138_vm11 = vweird.f32 %v536_v39 }
  0x22   :  { %v149_v46 = vmul.f32 %v391_v43, %v529_v37  ;;  %v91_v50 = vmul.f32 %v383_v36, %v90_v44  ;;  %394 = vrcp.f32 %v543_v45  ;;  %vm154_vm3 = vweird.f32 %v391_v43  ;;  %vm575_vm9 = vmor %vm123_vm5, %vm124_vm6 }
  0x23   :  { %v120_v51 = vsub.f32 1.0, %v119_v47  ;;  %vm565_vm7 = vmor %vm153_vm2, %vm154_vm3  ;;  %v144_v16 = vand.u32 2147483648, %v536_v39  ;;  %v142_v23 = vand.u32 2147483647, %v536_v39  ;;  %396 = vlog2.f32 %v518_v30 }
  0x24   :  { %v150_v49 = vsub.f32 1.0, %v149_v46  ;;  %v92_v54 = vadd.f32 %v383_v36, %v91_v50  ;;  %vm108_vm2 = vweird.f32 %v543_v45  ;;  %v114_v44 = vand.u32 2147483648, %v543_v45 }
  0x25   :  { %v121_v56 = vmul.f32 %v389_v42, %v120_v51  ;;  %v145_v31 = vor.u32 1.1754944e-38, %v144_v16  ;;  %vm143_vm1 = vcmp.eq.f32.partialorder %v142_v23, 8.507059e+37  ;;  %398 = vlog2.f32 %v536_v39 }
  0x26   :  { %v151_v53 = vmul.f32 %v391_v43, %v150_v49  ;;  %v96_v2 = vsel %vm555_vm4, %v383_v36, %v92_v54  ;;  %vm165_vm4 = vcmp.ge.f32.partialorder %v494_v14, 0.0  ;;  %v614_v49 = vand.u32 127, %v26_v25 }
  0x27   :  { %v547_v48 = vpop.eup %392  ;;  %v122_v4 = vadd.f32 %v389_v42, %v121_v56  ;;  %v101_v13 = vsel %vm98_vm8, %v100_v3, %v96_v2  ;;  %v115_v60 = vor.u32 1.1754944e-38, %v114_v44  ;;  %400 = vlog2.f32 %v524_v34 }
  0x28   :  { %v134_v52 = vmul.f32 %v547_v48, %v536_v39  ;;  %v560_v59 = vpop.eup %394  ;;  %v152_v62 = vadd.f32 %v391_v43, %v151_v53  ;;  %vm139_vm12 = vweird.f32 %v547_v48  ;;  %v168_v28 = vmul.f32 %v515_v27, %v101_v13 }
  0x29   :  { %v104_v6 = vmul.f32 %v560_v59, %v543_v45  ;;  %v126_v15 = vsel %vm575_vm9, %v389_v42, %v122_v4  ;;  %vm589_vm14 = vmor %vm138_vm11, %vm139_vm12  ;;  %v231_v42 = vmul.f32 -0.5, %v515_v27  ;;  %vm109_vm3 = vweird.f32 %v560_v59  ;;  %v397_v56 = vpop.eup %396 }
  0x2a   :  { %v135_v61 = vsub.f32 1.0, %v134_v52  ;;  %v156_v10 = vsel %vm565_vm7, %v391_v43, %v152_v62  ;;  %v131_v26 = vsel %vm128_vm13, %v130_v12, %v126_v15  ;;  %v607_v43 = vsel %vm163_vm15, %v101_v13, %v168_v28  ;;  %vm616_vm5 = vmor %vm108_vm2, %vm109_vm3 }
  0x2b   :  { %v105_v17 = vsub.f32 1.0, %v104_v6  ;;  %v161_v19 = vsel %vm158_vm10, %v160_v7, %v156_v10  ;;  %v170_v40 = vmul.f32 %v521_v32, %v131_v26  ;;  %v623_v53 = vmul.f32 2.0, %v607_v43 }
  0x2c   :  { %v136_v9 = vmul.f32 %v547_v48, %v135_v61  ;;  %v172_v29 = vmul.f32 %v526_v35, %v161_v19  ;;  %v232_v54 = vadd.f32 1.0, %v231_v42  ;;  %vm166_vm7 = vcmp.ge.f32.partialorder %v506_v21, 0.0 }
  0x2d   :  { %v106_v33 = vmul.f32 %v560_v59, %v105_v17  ;;  %v620_v52 = vsel %vm165_vm4, %v131_v26, %v170_v40  ;;  %v258_v61 = vmul.f32 -0.5, %v532_v38  ;;  %v183_v3 = vsub.f32 1.0, %v623_v53 }
  0x2e   :  { %v137_v20 = vadd.f32 %v547_v48, %v136_v9  ;;  %v610_v30 = vsel %vm167_vm0, %v161_v19, %v172_v29  ;;  %v180_v2 = vmul.f32 2.0, %v620_v52  ;;  %v213_v4 = vmax.f32 %v488_v11, 0.0  ;;  %v399_v19 = vpop.eup %398 }
  0x2f   :  { %v107_v47 = vadd.f32 %v560_v59, %v106_v33  ;;  %v182_v57 = vmul.f32 2.0, %v610_v30  ;;  %v640_v5 = vmul.f32 0.6931472, %v397_v56  ;;  %v643_v6 = vmul.f32 %v515_v27, %v232_v54 }
  0x30   :  { %v141_v36 = vsel %vm589_vm14, %v547_v48, %v137_v20  ;;  %v112_v48 = vand.u32 2147483647, %v543_v45  ;;  %vm647_vm9 = vcmp.lt.f32.partialorder %v234_v55, 0.0004427343  ;;  %v259_v9 = vadd.f32 1.0, %v258_v61 }
  0x31   :  { %v146_v46 = vsel %vm143_vm1, %v145_v31, %v141_v36  ;;  %v111_v62 = vsel %vm616_vm5, %v560_v59, %v107_v47  ;;  %v187_v8 = vsub.f32 1.0, %v182_v57  ;;  %v261_v12 = vand.u32 2147483647, %v532_v38  ;;  %v401_v31 = vpop.eup %400 }
  0x32   :  { %v171_v58 = vmul.f32 %v532_v38, %v146_v46  ;;  %vm113_vm8 = vcmp.eq.f32.partialorder %v112_v48, 8.507059e+37  ;;  %v249_v13 = vmul.f32 -0.5, %v521_v32  ;;  %402 = vlog2.f32 %v529_v37 }
  0x33   :  { %v116_v7 = vsel %vm113_vm8, %v115_v60, %v111_v62  ;;  %v215_v27 = vmax.f32 %v494_v14, 0.0  ;;  %v267_v17 = vmul.f32 -0.5, %v526_v35  ;;  %v185_v20 = vsub.f32 1.0, %v180_v2 }
  0x34   :  { %v645_v59 = vsel %vm166_vm7, %v146_v46, %v171_v58  ;;  %v169_v16 = vmul.f32 %v539_v41, %v116_v7  ;;  %v216_v34 = vmax.f32 %v506_v21, 0.0  ;;  %vm164_vm10 = vcmp.ge.f32.partialorder %v511_v22, 0.0 }
  0x35   :  { %v658_v15 = vmul.f32 2.0, %v645_v59  ;;  %v673_v24 = vmul.f32 %v532_v38, %v259_v9  ;;  %404 = vlog2.f32 %v543_v45  ;;  %vm678_vm11 = vcmp.lt.f32.partialorder %v261_v12, 0.0004427343 }
  0x36   :  { %v250_v28 = vadd.f32 1.0, %v249_v13  ;;  %v240_v29 = vmul.f32 -0.5, %v539_v41  ;;  %v684_v42 = vmul.f32 0.6931472, %v399_v19  ;;  %v174_v38 = vsel %vm164_vm10, %v116_v7, %v169_v16 }
  0x37   :  { %v186_v40 = vsub.f32 1.0, %v658_v15  ;;  %v268_v44 = vadd.f32 1.0, %v267_v17  ;;  %v252_v45 = vand.u32 2147483647, %v521_v32  ;;  %v270_v47 = vand.u32 2147483647, %v526_v35 }
  0x38   :  { %v403_v46 = vpop.eup %402  ;;  %v243_v53 = vand.u32 2147483647, %v539_v41  ;;  %v179_v54 = vmul.f32 2.0, %v174_v38  ;;  %v248_v55 = vmul.f32 0.6931472, %v401_v31  ;;  %v251_v56 = vmul.f32 %v521_v32, %v250_v28 }
  0x39   :  { %v241_v57 = vadd.f32 1.0, %v240_v29  ;;  %v266_v62 = vmul.f32 0.6931472, %v403_v46  ;;  %vm698_vm14 = vcmp.lt.f32.partialorder %v252_v45, 0.0004427343  ;;  %vm324_vm3 = vcmask 130048  }
  0x3a   :  { %vm702_vm15 = vcmp.lt.f32.partialorder %v270_v47, 0.0004427343  ;;  %vm711_vm0 = vcmp.lt.f32.partialorder %v243_v53, 0.0004427343  ;;  %vm19_vm4 = vcmask 0  }
  0x3b   :  { %v405_v58 = vpop.eup %404  ;;  %20 = vst.msk [vmem:[#allocation2] sm:$0x1] %vm19_vm4, %v433_v0 }
  0x5e   :  { %v47_v51 = vpop.permute.xlu2 %46 }
  0x5f   :  { %vm52_vm6 = vcmp.eq.s32.totalorder %v614_v49, %v47_v51  ;;  %v214_v51 = vmax.f32 %v511_v22, 0.0 }
  0x60   :  { %v367_v1 = vsel %vm52_vm6, 1.0, %v433_v0 }
  0x61   :  { %v222_v10 = vmul.f32 %v367_v1, %v500_v18  ;;  %v236_v18 = vsel %vm647_vm9, %v643_v6, %v640_v5  ;;  %v668_v37 = vmul.f32 %v367_v1, %v187_v8  ;;  %v670_v23 = vmul.f32 -0.5, %v367_v1 }
  0x63   :  { %v676_v25 = vsub.f32 %v217_v63, %v222_v10  ;;  %v269_v63 = vmul.f32 %v526_v35, %v268_v44  ;;  %v239_v35 = vmul.f32 0.6931472, %v405_v58 }
  0x65   :  { %v272_v15 = vsel %vm702_vm15, %v269_v63, %v266_v62 }
  0x74   :  { %v41_v33 = vpop.permute.xlu1 %40  ;;  %v35_v36 = vpop.permute.xlu0 %34 }
  0x75   :  { %vm50_vm12 = vcmp.eq.s32.totalorder %v614_v49, %v41_v33  ;;  %vm48_vm13 = vcmp.eq.s32.totalorder %v614_v49, %v35_v36  ;;  %v207_v36 = vadd.f32 0.75, %v670_v23  ;;  %v277_v23 = vadd.f32 %v272_v15, %v676_v25 }
  0x76   :  { %v365_v48 = vsel %vm50_vm12, 1.0, %v433_v0  ;;  %v363_v50 = vsel %vm48_vm13, 1.0, %v433_v0 }
  0x77   :  { %v220_v60 = vmul.f32 %v365_v48, %v494_v14  ;;  %v218_v61 = vmul.f32 %v363_v50, %v488_v11  ;;  %v200_v1 = vmul.f32 -0.5, %v365_v48  ;;  %v188_v2 = vmul.f32 %v363_v50, %v183_v3 }
  0x78   :  { %v190_v32 = vmul.f32 %v365_v48, %v185_v20  ;;  %v198_v7 = vmul.f32 -0.5, %v363_v50  ;;  %v263_v11 = vsel %vm678_vm11, %v673_v24, %v684_v42  ;;  %v184_v14 = vsub.f32 1.0, %v179_v54 }
  0x79   :  { %v223_v8 = vsub.f32 %v213_v4, %v218_v61  ;;  %v242_v3 = vmul.f32 %v539_v41, %v241_v57  ;;  %v225_v9 = vsub.f32 %v215_v27, %v220_v60  ;;  %v254_v4 = vsel %vm698_vm14, %v251_v56, %v248_v55 }
  0x7a   :  { %v205_v16 = vadd.f32 0.75, %v200_v1  ;;  %v193_v17 = vadd.f32 %v188_v2, %v607_v43  ;;  %v203_v41 = vadd.f32 0.75, %v198_v7  ;;  %v195_v20 = vadd.f32 %v190_v32, %v620_v52 }
  0x7b   :  { %v273_v10 = vadd.f32 %v236_v18, %v223_v8  ;;  %v275_v33 = vadd.f32 %v254_v4, %v225_v9  ;;  %v245_v44 = vsel %vm711_vm0, %v242_v3, %v239_v35  ;;  %v197_v52 = vadd.f32 %v668_v37, %v610_v30 }
  0x7c   :  { %v44_v12 = vpop.permute.xlu1 %43  ;;  %v38_v13 = vpop.permute.xlu0 %37  ;;  %v210_v50 = vmul.f32 %v195_v20, %v195_v20  ;;  %v282_v61 = vmul.f32 %v277_v23, %v207_v36 }
  0x7d   :  { %vm51_vm1 = vcmp.eq.s32.totalorder %v614_v49, %v44_v12  ;;  %vm49_vm2 = vcmp.eq.s32.totalorder %v614_v49, %v38_v13  ;;  %v278_v29 = vmul.f32 %v273_v10, %v203_v41  ;;  %v296_v49 = vpop.permute.xlu2 %295  ;;  %v212_v37 = vmul.f32 %v197_v52, %v197_v52 }
  0x7e   :  { %v366_v19 = vsel %vm51_vm1, 1.0, %v433_v0  ;;  %v364_v27 = vsel %vm49_vm2, 1.0, %v433_v0 }
  0x7f   :  { %v191_v18 = vmul.f32 %v366_v19, %v186_v40  ;;  %v201_v24 = vmul.f32 -0.5, %v366_v19  ;;  %v221_v26 = vmul.f32 %v366_v19, %v506_v21  ;;  %v189_v28 = vmul.f32 %v364_v27, %v184_v14  ;;  %v323_v19 = vld [vmem:[#allocation2] sm:$0x1] }
  0x80   :  { %v199_v31 = vmul.f32 -0.5, %v364_v27  ;;  %v219_v43 = vmul.f32 %v364_v27, %v511_v22  ;;  %v208_v40 = vmul.f32 %v193_v17, %v193_v17  ;;  %v280_v21 = vmul.f32 %v275_v33, %v205_v16 }
  0x81   :  { %v226_v42 = vsub.f32 %v216_v34, %v221_v26  ;;  %v196_v46 = vadd.f32 %v191_v18, %v645_v59  ;;  %v194_v47 = vadd.f32 %v189_v28, %v174_v38  ;;  %v206_v48 = vadd.f32 0.75, %v201_v24 }
  0x82   :  { %v224_v45 = vsub.f32 %v214_v51, %v219_v43  ;;  %v283_v53 = vmul.f32 %v278_v29, %v208_v40  ;;  %v204_v54 = vadd.f32 0.75, %v199_v31  ;;  %v285_v51 = vmul.f32 %v280_v21, %v210_v50 }
  0x83   :  { %v276_v22 = vadd.f32 %v263_v11, %v226_v42  ;;  %v211_v57 = vmul.f32 %v196_v46, %v196_v46  ;;  %v209_v58 = vmul.f32 %v194_v47, %v194_v47  ;;  %v287_v32 = vmul.f32 %v282_v61, %v212_v37 }
  0x84   :  { %v301_v34 = vpop.permute.xlu0 %300  ;;  %v274_v55 = vadd.f32 %v245_v44, %v224_v45  ;;  %v306_v30 = vpop.permute.xlu1 %305  ;;  %v318_v62 = vmul.f32 %v296_v49, %v283_v53 }
  0x85   :  { %v281_v56 = vmul.f32 %v276_v22, %v206_v48  ;;  %v320_v63 = vmul.f32 %v306_v30, %v285_v51  ;;  %v311_v25 = vpop.permute.xlu2 %310 }
  0x86   :  { %v279_v60 = vmul.f32 %v274_v55, %v204_v54  ;;  %v325_v2 = vsel %vm324_vm3, %v318_v62, 0.0 }
  0x87   :  { %v286_v59 = vmul.f32 %v281_v56, %v211_v57  ;;  %v328_v11 = vsel %vm324_vm3, %v320_v63, 0.0 }
  0x88   :  { %v284_v38 = vmul.f32 %v279_v60, %v209_v58 }
  0x89   :  { %v321_v7 = vmul.f32 %v311_v25, %v286_v59 }
  0x8a   :  { %v319_v1 = vmul.f32 %v301_v34, %v284_v38 }
  0x8b   :  { %v330_v3 = vsel %vm324_vm3, %v321_v7, 0.0 }
  0x8c   :  { %v326_v5 = vsel %vm324_vm3, %v319_v1, 0.0  ;;  %v316_v6 = vpop.permute.xlu0 %315 }
  0x8d   :  { %v327_v8 = vadd.f32 %v326_v5, %v325_v2  ;;  %v322_v14 = vmul.f32 %v316_v6, %v287_v32 }
  0x8f   :  { %v329_v35 = vadd.f32 %v328_v11, %v327_v8  ;;  %v332_v9 = vsel %vm324_vm3, %v322_v14, 0.0 }
  0x91   :  { %v331_v39 = vadd.f32 %v330_v3, %v329_v35 }
  0x93   :  { %v333_v10 = vadd.f32 %v332_v9, %v331_v39 }
  0x95   :  { %334 = vadd.xlane.f32.xlu1 %v333_v10 }
 0x108   :  { %v335_v12 = vpop.xlane.xlu1 %334 }
 0x109   :  { %v336_v13 = vrot.slane %v335_v12, 4 }
 0x10b   :  { %v337_v4 = vadd.f32 %v336_v13, %v335_v12 }
 0x10d   :  { %v338_v15 = vrot.slane %v337_v4, 2 }
 0x10f   :  { %v339_v16 = vadd.f32 %v338_v15, %v337_v4 }
 0x111   :  { %v340_v17 = vrot.slane %v339_v16, 1 }
 0x113   :  { %v341_v41 = vadd.f32 %v340_v17, %v339_v16 }
 0x115   :  { %368 = vpush %v341_v41 }
 0x146   :  { %s369_s17 = spop %368 }
 0x147   :  { %v343_v27 = vstv %s369_s17 }
 0x148   :  { %v344_v20 = vadd.f32 %v343_v27, %v323_v19 }
 0x14a   :  { %346 = vst.msk [vmem:[#allocation2] sm:$0x1] %vm19_vm4, %v344_v20 }
 0x14b   :  { %357 = dma.vmem_to_hbm [thread:$0]  %s353_s13, 16, %s355_s16, [#allocation3]  }
 0x14c   :  { %430 = dma.done.wait [#allocation3], 16  }
 0x14d   :  { %431 = vsyncadd [#allocation3], 4294967280 }
 0x14e   :  { %362 = vsyncpa [#allocation3], 1 }

</bundles_post_ra>
